<compile_context>
chip_gen: v6e
topology: v6e:2x2x1
jax: 0.10.0
libtpu: 0.0.40
codegen_flags: <defaults>
</compile_context>

<pallas_src>
import jax
import jax.numpy as jnp
from jax.experimental import pallas as pl
from jax.experimental.pallas import tpu as pltpu

BN_EPS = 0.8  # second positional arg of nn.BatchNorm2d(out_size, 0.8) is eps


# ----------------------------------------------------------------------------
# Pass 1: nearest-upsample (rows) + 3x3 conv + partial BN statistics
# ----------------------------------------------------------------------------
def _conv_stats_kernel(xc_ref, w3_ref, conv_ref, stats_ref):
    # xc_ref   : (1, H+2, W2, 3*Cin)  kw-im2col'd, column-doubled, zero-row-padded
    #                                  input for one batch element (compute dtype)
    # w3_ref   : (3, 3*Cin, Cout)     conv weight, one fat (3*Cin, Cout) slab per kh
    # conv_ref : (1, TM2, W2, Cout)   raw conv output tile (compute dtype)
    # stats_ref: (1, 1, 8, Cout)      row 0 = per-channel sum, row 1 = sum of squares (f32)
    _, tm2, w2, cout = conv_ref.shape
    k3 = w3_ref.shape[1]                       # 3 * Cin
    tmin = tm2 // 2                            # input rows per output-row tile
    r0 = pl.program_id(1) * tmin               # first input row (padded coords)

    # Rows r0 .. r0+tmin+1 of the padded input cover this tile plus its 1-row
    # halo in the upsampled domain.  Nearest 2x row-upsample = repeat each row
    # twice (leading-dim broadcast + leading-dim reshape; no cross-lane work).
    s = xc_ref[0, pl.ds(r0, tmin + 2), :, :]                        # (tmin+2, W2, 3*Cin)
    u = jnp.broadcast_to(s[:, None], (tmin + 2, 2, w2, k3))
    u = u.reshape(2 * tmin + 4, w2, k3)                             # (TM2+4, W2, 3*Cin)

    # 3x3 conv as 3 matmuls with K = 3*Cin (kw already folded into the lane
    # axis by the wrapper); only leading-dim slices here -> no relayout work.
    acc = jnp.zeros((tm2 * w2, cout), jnp.float32)
    for kh in range(3):
        rows = u[1 + kh:1 + kh + tm2].reshape(tm2 * w2, k3)
        acc = acc + jnp.dot(rows, w3_ref[kh],
                            preferred_element_type=jnp.float32)

    conv_ref[...] = acc.reshape(1, tm2, w2, cout).astype(conv_ref.dtype)

    # Partial BatchNorm statistics for this tile, taken from the f32
    # accumulator BEFORE the (possibly bf16) downcast store.
    ssum = jnp.sum(acc, axis=0, keepdims=True)                      # (1, Cout)
    ssq = jnp.sum(acc * acc, axis=0, keepdims=True)                 # (1, Cout)
    rid = jax.lax.broadcasted_iota(jnp.int32, (8, cout), 0)
    stats = jnp.where(rid == 0, ssum, 0.0) + jnp.where(rid == 1, ssq, 0.0)
    stats_ref[...] = stats.reshape(1, 1, 8, cout)


# ----------------------------------------------------------------------------
# Pass 2: folded BN affine + ReLU + channel concat with skip (streaming pass)
# ----------------------------------------------------------------------------
def _bn_relu_concat_kernel(scale_ref, bias_ref, conv_ref, skip_ref, out_ref):
    # scale/bias: (1, Cout) folded BN affine (f32)
    # conv_ref  : (1, TM2, W2, Cout)  compute-dtype conv intermediate
    # skip_ref  : (1, TM2, W2, Cout)  skip input in its native dtype
    # out_ref   : (1, TM2, W2, 2*Cout) lane-dense store of [BN+ReLU(conv), skip]
    y = conv_ref[...].astype(jnp.float32) * scale_ref[...] + bias_ref[...]
    y = jnp.maximum(y, 0.0)
    out_ref[...] = jnp.concatenate(
        [y.astype(out_ref.dtype), skip_ref[...].astype(out_ref.dtype)], axis=-1)


def _pick_row_tile(h2, w2, cout, cap=64, out_block_budget=2 * 1024 * 1024):
    """Largest even divisor of h2 (<= cap) whose pass-2 output block fits budget."""
    t = min(cap, h2)
    t -= t % 2
    t = max(t, 2)
    while t > 2 and (h2 % t or t * w2 * 2 * cout * 4 > out_block_budget):
        t -= 2
    return max(t, 2)


def _vmem_limit_bytes(frac=0.75, fallback=64 * 1024 * 1024):
    """Generation-aware scoped-VMEM limit (~96 MiB on v5e/v6e, ~48 MiB on v7x)."""
    try:
        cap = int(pltpu.get_tpu_info().vmem_capacity_bytes)
    except Exception:
        return fallback
    return max(32 * 1024 * 1024, int(cap * frac))


def unet_up_forward_nhwc(x, skip, w_oihw, gamma, beta, *,
                         row_tile=None, compute_dtype=jnp.bfloat16,
                         out_dtype=jnp.float32):
    """UNetUp forward, NHWC in / NHWC out (preferred TPU layout)."""
    N, H, W, Cin = x.shape
    Cout = w_oihw.shape[0]
    H2, W2 = 2 * H, 2 * W
    assert skip.shape == (N, H2, W2, Cout), skip.shape

    tm2 = row_tile if row_tile is not None else _pick_row_tile(H2, W2, Cout)
    assert tm2 % 2 == 0 and H2 % tm2 == 0, (tm2, H2)
    n_ht = H2 // tm2

    # Cheap glue on the SMALL pre-upsample tensor only, done directly in the
    # compute dtype (halves the HBM cost of these intermediates):
    #   * nearest column-doubling (row-doubling happens inside the kernel, so
    #     the 4x-larger upsampled activation never touches HBM),
    #   * 1-pixel zero pad on rows & columns,
    #   * kw-axis im2col concat -> last dim 3*Cin.  Precomputing it here (3x
    #     HBM on the small tensor) removes the sublane-misaligned kw shifts and
    #     lane relayout that previously ran per kernel-row per tile.
    xw = x.astype(compute_dtype)
    xw = jnp.repeat(xw, 2, axis=2)                                   # (N, H, W2, Cin)
    xw = jnp.pad(xw, ((0, 0), (1, 1), (1, 1), (0, 0)))               # (N, H+2, W2+2, Cin)
    xcat = jnp.concatenate(
        [xw[:, :, 0:W2, :], xw[:, :, 1:W2 + 1, :], xw[:, :, 2:W2 + 2, :]],
        axis=-1)                                                     # (N, H+2, W2, 3*Cin)

    # Weight: OIHW -> (kh, kw*Cin, Cout): one fat K=3*Cin slab per kernel row,
    # matching the kw-concat order above [kw=0 | kw=1 | kw=2].
    w3 = jnp.transpose(w_oihw, (2, 3, 1, 0)).reshape(3, 3 * Cin, Cout)
    w3 = w3.astype(compute_dtype)

    conv_dtype = compute_dtype
    cparams = pltpu.CompilerParams(
        dimension_semantics=("parallel", "parallel"),
        vmem_limit_bytes=_vmem_limit_bytes())

    # ---- pass 1: conv + partial BN statistics --------------------------------
    conv_out, stats = pl.pallas_call(
        _conv_stats_kernel,
        out_shape=(jax.ShapeDtypeStruct((N, H2, W2, Cout), conv_dtype),
                   jax.ShapeDtypeStruct((N, n_ht, 8, Cout), jnp.float32)),
        grid=(N, n_ht),
        in_specs=[
            pl.BlockSpec((1, H + 2, W2, 3 * Cin), lambda n, h: (n, 0, 0, 0)),
            pl.BlockSpec((3, 3 * Cin, Cout), lambda n, h: (0, 0, 0)),
        ],
        out_specs=(
            pl.BlockSpec((1, tm2, W2, Cout), lambda n, h: (n, h, 0, 0)),
            pl.BlockSpec((1, 1, 8, Cout), lambda n, h: (n, h, 0, 0)),
        ),
        compiler_params=cparams,
    )(xcat, w3)

    # ---- tiny per-channel reduction + folded affine (plain JAX, f32) ---------
    # TODO(synk): E[x^2]-E[x]^2 can cancel for huge activations; fine at eps=0.8.
    cnt = float(N * H2 * W2)
    mean = jnp.sum(stats[:, :, 0, :], axis=(0, 1)) / cnt
    var = jnp.maximum(jnp.sum(stats[:, :, 1, :], axis=(0, 1)) / cnt - mean * mean, 0.0)
    scale = gamma.astype(jnp.float32) * jax.lax.rsqrt(var + BN_EPS)
    bias = beta.astype(jnp.float32) - mean * scale

    # ---- pass 2: BN affine + ReLU + channel concat with skip -----------------
    out = pl.pallas_call(
        _bn_relu_concat_kernel,
        out_shape=jax.ShapeDtypeStruct((N, H2, W2, 2 * Cout), out_dtype),
        grid=(N, n_ht),
        in_specs=[
            pl.BlockSpec((1, Cout), lambda n, h: (0, 0)),
            pl.BlockSpec((1, Cout), lambda n, h: (0, 0)),
            pl.BlockSpec((1, tm2, W2, Cout), lambda n, h: (n, h, 0, 0)),
            pl.BlockSpec((1, tm2, W2, Cout), lambda n, h: (n, h, 0, 0)),
        ],
        out_specs=pl.BlockSpec((1, tm2, W2, 2 * Cout), lambda n, h: (n, h, 0, 0)),
        compiler_params=cparams,
    )(scale.reshape(1, Cout), bias.reshape(1, Cout), conv_out, skip)

    return out


def unet_up_forward(x_nchw, skip_nchw, w_oihw, gamma, beta, **kwargs):
    """PyTorch-facing NCHW wrapper around the NHWC Pallas implementation."""
    x = jnp.transpose(x_nchw, (0, 2, 3, 1))
    skip = jnp.transpose(skip_nchw, (0, 2, 3, 1))
    out_nhwc = unet_up_forward_nhwc(x, skip, w_oihw, gamma, beta, **kwargs)
    # Kept only for interface fidelity with the nn.Module; an NHWC consumer
    # should call unet_up_forward_nhwc directly and skip this transpose.
    return jnp.transpose(out_nhwc, (0, 3, 1, 2))


def _reference_forward(x_nchw, skip_nchw, w_oihw, gamma, beta):
    """Pure-JAX f32 reference (mirrors PyTorch training-mode forward)."""
    xu = jnp.repeat(jnp.repeat(x_nchw, 2, axis=2), 2, axis=3)
    y = jax.lax.conv_general_dilated(
        xu, w_oihw, window_strides=(1, 1), padding="SAME",
        dimension_numbers=("NCHW", "OIHW", "NCHW"))
    mean = jnp.mean(y, axis=(0, 2, 3), keepdims=True)
    var = jnp.mean((y - mean) ** 2, axis=(0, 2, 3), keepdims=True)
    y = (y - mean) * jax.lax.rsqrt(var + BN_EPS)
    y = y * gamma[None, :, None, None] + beta[None, :, None, None]
    y = jnp.maximum(y, 0.0)
    return jnp.concatenate([y, skip_nchw], axis=1)


if __name__ == "__main__":
    # Small, module-consistent shapes.
    N, in_size, out_size, H, W = 2, 8, 8, 8, 8

    key = jax.random.PRNGKey(0)
    kx, ks, kw, kg, kb = jax.random.split(key, 5)

    x = jax.random.normal(kx, (N, in_size, H, W), jnp.float32)
    skip = jax.random.normal(ks, (N, out_size, 2 * H, 2 * W), jnp.float32)
    # Deterministic synthetic parameters (Conv2d weight OIHW, BN gamma/beta).
    w = 0.1 * jax.random.normal(kw, (out_size, in_size, 3, 3), jnp.float32)
    gamma = 1.0 + 0.1 * jax.random.normal(kg, (out_size,), jnp.float32)
    beta = 0.1 * jax.random.normal(kb, (out_size,), jnp.float32)

    ref = _reference_forward(x, skip, w, gamma, beta)

    # row_tile=8 -> 2 row tiles per image: exercises the tiled grid and the
    # cross-tile BatchNorm statistics accumulation.
    # Default (bf16 MXU operands + bf16 conv intermediate, f32 accumulation).
    out_bf16 = unet_up_forward(x, skip, w, gamma, beta, row_tile=8)
    out_bf16 = jax.block_until_ready(out_bf16)
    assert out_bf16.shape == (N, 2 * out_size, 2 * H, 2 * W), out_bf16.shape
    assert jnp.allclose(out_bf16, ref, rtol=5e-2, atol=1e-1), "bf16 path mismatch"

    # Explicit f32 path holds the tight tolerance against the f32 reference.
    out_f32 = unet_up_forward(x, skip, w, gamma, beta, row_tile=8,
                              compute_dtype=jnp.float32)
    out_f32 = jax.block_until_ready(out_f32)
    assert jnp.allclose(out_f32, ref, rtol=1e-4, atol=1e-4), "f32 path mismatch"

    print("KERNEL_OK")
</pallas_src>

<mosaic_0001>
module attributes {stable_mosaic.version = 11 : i64} {
  func.func @_conv_stats_kernel(%arg0: i32, %arg1: i32, %arg2: memref<1x10x16x24xbf16, #tpu.memory_space<vmem>>, %arg3: memref<3x24x8xbf16, #tpu.memory_space<vmem>>, %arg4: memref<1x8x16x8xbf16, #tpu.memory_space<vmem>>, %arg5: memref<1x1x8x8xf32, #tpu.memory_space<vmem>>) attributes {dimension_semantics = [#tpu.dimension_semantics<parallel>, #tpu.dimension_semantics<parallel>], iteration_bounds = array<i64: 2, 2>, scalar_prefetch = 0 : i64, scratch_operands = 0 : i64, tpu.core_type = #tpu.core_type<tc>, window_params = [{transform_indices = @transform_0, window_bounds = array<i64: 1, 10, 16, 24>}, {pipeline_mode = #tpu.pipeline_mode<synchronous>, transform_indices = @transform_1, window_bounds = array<i64: 3, 24, 8>}, {transform_indices = @transform_2, window_bounds = array<i64: 1, 8, 16, 8>}, {transform_indices = @transform_3, window_bounds = array<i64: 1, 1, 8, 8>}]} {
    %c4_i32 = arith.constant 4 : i32
    %0 = arith.muli %arg1, %c4_i32 : i32
    %c0 = arith.constant 0 : index
    %1 = arith.index_cast %0 : i32 to index
    %c0_0 = arith.constant 0 : index
    %c0_1 = arith.constant 0 : index
    %2 = vector.load %arg2[%c0, %1, %c0_0, %c0_1] : memref<1x10x16x24xbf16, #tpu.memory_space<vmem>>, vector<1x6x16x24xbf16>
    %3 = vector.shape_cast %2 : vector<1x6x16x24xbf16> to vector<6x16x24xbf16>
    %4 = vector.shape_cast %3 : vector<6x16x24xbf16> to vector<6x1x16x24xbf16>
    %5 = vector.shape_cast %4 : vector<6x1x16x24xbf16> to vector<6x1x16x24xbf16>
    %6 = vector.broadcast %5 : vector<6x1x16x24xbf16> to vector<6x2x16x24xbf16>
    %7 = vector.shape_cast %6 : vector<6x2x16x24xbf16> to vector<12x16x24xbf16>
    %cst = arith.constant 0.000000e+00 : f32
    %8 = vector.broadcast %cst : f32 to vector<128x8xf32>
    %9 = vector.extract_strided_slice %7 {offsets = [1, 0, 0], sizes = [8, 16, 24], strides = [1, 1, 1]} : vector<12x16x24xbf16> to vector<8x16x24xbf16>
    %10 = vector.shape_cast %9 : vector<8x16x24xbf16> to vector<128x24xbf16>
    %c0_2 = arith.constant 0 : index
    %c0_3 = arith.constant 0 : index
    %c0_4 = arith.constant 0 : index
    %11 = vector.load %arg3[%c0_2, %c0_3, %c0_4] : memref<3x24x8xbf16, #tpu.memory_space<vmem>>, vector<1x24x8xbf16>
    %12 = vector.shape_cast %11 : vector<1x24x8xbf16> to vector<24x8xbf16>
    %cst_5 = arith.constant dense<0.000000e+00> : vector<128x8xf32>
    %13 = tpu.matmul %10, %12, %cst_5 {dimension_numbers = #tpu.dot_dimension_numbers<[1], [0], [0], [1], [0, 0, 1, 1], [], []>} : vector<128x24xbf16>, vector<24x8xbf16>, vector<128x8xf32> -> vector<128x8xf32>
    %14 = arith.addf %8, %13 : vector<128x8xf32>
    %15 = vector.extract_strided_slice %7 {offsets = [2, 0, 0], sizes = [8, 16, 24], strides = [1, 1, 1]} : vector<12x16x24xbf16> to vector<8x16x24xbf16>
    %16 = vector.shape_cast %15 : vector<8x16x24xbf16> to vector<128x24xbf16>
    %c1 = arith.constant 1 : index
    %c0_6 = arith.constant 0 : index
    %c0_7 = arith.constant 0 : index
    %17 = vector.load %arg3[%c1, %c0_6, %c0_7] : memref<3x24x8xbf16, #tpu.memory_space<vmem>>, vector<1x24x8xbf16>
    %18 = vector.shape_cast %17 : vector<1x24x8xbf16> to vector<24x8xbf16>
    %cst_8 = arith.constant dense<0.000000e+00> : vector<128x8xf32>
    %19 = tpu.matmul %16, %18, %cst_8 {dimension_numbers = #tpu.dot_dimension_numbers<[1], [0], [0], [1], [0, 0, 1, 1], [], []>} : vector<128x24xbf16>, vector<24x8xbf16>, vector<128x8xf32> -> vector<128x8xf32>
    %20 = arith.addf %14, %19 : vector<128x8xf32>
    %21 = vector.extract_strided_slice %7 {offsets = [3, 0, 0], sizes = [8, 16, 24], strides = [1, 1, 1]} : vector<12x16x24xbf16> to vector<8x16x24xbf16>
    %22 = vector.shape_cast %21 : vector<8x16x24xbf16> to vector<128x24xbf16>
    %c2 = arith.constant 2 : index
    %c0_9 = arith.constant 0 : index
    %c0_10 = arith.constant 0 : index
    %23 = vector.load %arg3[%c2, %c0_9, %c0_10] : memref<3x24x8xbf16, #tpu.memory_space<vmem>>, vector<1x24x8xbf16>
    %24 = vector.shape_cast %23 : vector<1x24x8xbf16> to vector<24x8xbf16>
    %cst_11 = arith.constant dense<0.000000e+00> : vector<128x8xf32>
    %25 = tpu.matmul %22, %24, %cst_11 {dimension_numbers = #tpu.dot_dimension_numbers<[1], [0], [0], [1], [0, 0, 1, 1], [], []>} : vector<128x24xbf16>, vector<24x8xbf16>, vector<128x8xf32> -> vector<128x8xf32>
    %26 = arith.addf %20, %25 : vector<128x8xf32>
    %27 = vector.shape_cast %26 : vector<128x8xf32> to vector<1x8x16x8xf32>
    %28 = arith.truncf %27 : vector<1x8x16x8xf32> to vector<1x8x16x8xbf16>
    %c0_12 = arith.constant 0 : index
    %c0_13 = arith.constant 0 : index
    %c0_14 = arith.constant 0 : index
    %c0_15 = arith.constant 0 : index
    %29 = vector.load %arg4[%c0_12, %c0_13, %c0_14, %c0_15] : memref<1x8x16x8xbf16, #tpu.memory_space<vmem>>, vector<1x8x16x8xbf16>
    tpu.vector_store %arg4[%c0_12, %c0_13, %c0_14, %c0_15], %28 {strides = array<i32>} : memref<1x8x16x8xbf16, #tpu.memory_space<vmem>>, vector<1x8x16x8xbf16>,
    %cst_16 = arith.constant dense<0.000000e+00> : vector<8xf32>
    %30 = vector.multi_reduction <add>, %26, %cst_16 [0] : vector<128x8xf32> to vector<8xf32>
    %31 = vector.shape_cast %30 : vector<8xf32> to vector<1x8xf32>
    %32 = arith.mulf %26, %26 : vector<128x8xf32>
    %cst_17 = arith.constant dense<0.000000e+00> : vector<8xf32>
    %33 = vector.multi_reduction <add>, %32, %cst_17 [0] : vector<128x8xf32> to vector<8xf32>
    %34 = vector.shape_cast %33 : vector<8xf32> to vector<1x8xf32>
    %35 = tpu.iota {dimensions = array<i32: 0>} : vector<8x8xi32>
    %c0_i32 = arith.constant 0 : i32
    %36 = vector.broadcast %c0_i32 : i32 to vector<8x8xi32>
    %37 = arith.cmpi eq, %35, %36 : vector<8x8xi32>
    %cst_18 = arith.constant 0.000000e+00 : f32
    %38 = vector.shape_cast %31 : vector<1x8xf32> to vector<1x8xf32>
    %39 = vector.broadcast %38 : vector<1x8xf32> to vector<8x8xf32>
    %40 = vector.broadcast %cst_18 : f32 to vector<8x8xf32>
    %41 = arith.select %37, %39, %40 : vector<8x8xi1>, vector<8x8xf32>
    %c1_i32 = arith.constant 1 : i32
    %42 = vector.broadcast %c1_i32 : i32 to vector<8x8xi32>
    %43 = arith.cmpi eq, %35, %42 : vector<8x8xi32>
    %cst_19 = arith.constant 0.000000e+00 : f32
    %44 = vector.shape_cast %34 : vector<1x8xf32> to vector<1x8xf32>
    %45 = vector.broadcast %44 : vector<1x8xf32> to vector<8x8xf32>
    %46 = vector.broadcast %cst_19 : f32 to vector<8x8xf32>
    %47 = arith.select %43, %45, %46 : vector<8x8xi1>, vector<8x8xf32>
    %48 = arith.addf %41, %47 : vector<8x8xf32>
    %49 = vector.shape_cast %48 : vector<8x8xf32> to vector<1x1x8x8xf32>
    %c0_20 = arith.constant 0 : index
    %c0_21 = arith.constant 0 : index
    %c0_22 = arith.constant 0 : index
    %c0_23 = arith.constant 0 : index
    %50 = vector.load %arg5[%c0_20, %c0_21, %c0_22, %c0_23] : memref<1x1x8x8xf32, #tpu.memory_space<vmem>>, vector<1x1x8x8xf32>
    tpu.vector_store %arg5[%c0_20, %c0_21, %c0_22, %c0_23], %49 {strides = array<i32>} : memref<1x1x8x8xf32, #tpu.memory_space<vmem>>, vector<1x1x8x8xf32>,
    return
  }
  func.func @transform_0(%arg0: i32, %arg1: i32) -> (i32, i32, i32, i32) {
    %c0_i32 = arith.constant 0 : i32
    %c0_i32_0 = arith.constant 0 : i32
    %c0_i32_1 = arith.constant 0 : i32
    %c0_i32_2 = arith.constant 0 : i32
    return %arg0, %c0_i32, %c0_i32_0, %c0_i32_1 : i32, i32, i32, i32
  }
  func.func @transform_1(%arg0: i32, %arg1: i32) -> (i32, i32, i32) {
    %c0_i32 = arith.constant 0 : i32
    %c0_i32_0 = arith.constant 0 : i32
    %c0_i32_1 = arith.constant 0 : i32
    %c0_i32_2 = arith.constant 0 : i32
    return %c0_i32, %c0_i32_0, %c0_i32_1 : i32, i32, i32
  }
  func.func @transform_2(%arg0: i32, %arg1: i32) -> (i32, i32, i32, i32) {
    %c0_i32 = arith.constant 0 : i32
    %c0_i32_0 = arith.constant 0 : i32
    %c0_i32_1 = arith.constant 0 : i32
    return %arg0, %arg1, %c0_i32, %c0_i32_0 : i32, i32, i32, i32
  }
  func.func @transform_3(%arg0: i32, %arg1: i32) -> (i32, i32, i32, i32) {
    %c0_i32 = arith.constant 0 : i32
    %c0_i32_0 = arith.constant 0 : i32
    %c0_i32_1 = arith.constant 0 : i32
    return %arg0, %arg1, %c0_i32, %c0_i32_0 : i32, i32, i32, i32
  }
}

</mosaic_0001>

<bundles_post_ra>
// kernel: tpu_custom_call.1
= control target key start
LH: loop header
LB: loop body
LE: loop exit
PB: predicated region body
PF: predicated region fallthrough
CT: control target
= control target key end

     0   :  { %9 = vsyncpa [#allocation3], 0  ;;  %s1806_s0 = inlined_call_operand.hbm [shape: bf16[2,10,16,24], index: 0, kind: input, shape index: {}]   ;;  %s1807_s1 = inlined_call_operand.vmem [shape: bf16[3,24,8], index: 1, kind: input, shape index: {}]   ;;  %s1808_s2 = inlined_call_operand.vmem [shape: bf16[2,16,16,8], index: 2, kind: output, shape index: {0}]   ;;  %s1809_s3 = inlined_call_operand.hbm [shape: f32[2,2,8,8], index: 3, kind: output, shape index: {1}]  }
   0x1   :  { %11 = vsyncpa [#allocation3 + $0x1], 0 }
   0x2   :  { %12 = vsyncpa [#allocation4], 0 }
   0x3   :  { %14 = vsyncpa [#allocation4 + $0x1], 0  ;;  %s1473_s12 = smov 0   ;;  %s1475_s13 = smov 0  }
   0x4   :  { %s1477_s14 = smov 0   ;;  %s1479_s15 = smov 0  }
   0x5   :  { %s1481_s16 = smov 0   ;;  %s1483_s17 = smov 0  }
   0x6   :  { %s1485_s18 = smov 0   ;;  %s1487_s19 = smov 0  }
   0x7   :  { %s1489_s20 = smov 0   ;;  %s1491_s21 = smov 0  }
   0x8   :  { %s1493_s22 = smov 0  }
   0x9 LB: > { %1814 = sst [smem:[#allocation8_spill]] %s1439_s20  ;;  %s987_s23 = sadd.s32 4294967295, %s1447_s22   ;;  %s1447_s22 = sphi %s1493_s22, %s20_s22   ;;  %s1443_s21 = sphi %s1491_s21, %s1826_s21   ;;  %s1439_s20 = sphi %s1489_s20, %s1825_s20   ;;  %s1435_s19 = sphi %s1487_s19, %s1824_s19   ;;  %s1431_s18 = sphi %s1485_s18, %s1823_s18   ;;  %s1427_s17 = sphi %s1483_s17, %s1832_s17   ;;  %s1423_s16 = sphi %s1481_s16, %s1831_s16   ;;  %s1419_s15 = sphi %s1479_s15, %s1830_s15   ;;  %s1415_s14 = sphi %s1477_s14, %s1829_s14   ;;  %s1411_s13 = sphi %s1475_s13, %s1828_s13   ;;  %s1407_s12 = sphi %s1473_s12, %s1827_s12  }
   0xa   : > { %1815 = sst [smem:[#allocation9_spill]] %s1443_s21  ;;  %s988_s24 = sadd.s32 4294967294, %s1447_s22  }
   0xb   : > { %s29_s25 = sadd.s32 1, %s1439_s20  ;;  %s32_s26 = sadd.s32 1, %s1443_s21 }
   0xc   : > { %p30_p0 = scmp.ge.s32.totalorder %s29_s25, 2  ;;  %s39_s27 = sadd.s32 1, %s1427_s17 }
   0xd   : > { %p46_p1 = scmp.ne.s32.totalorder %s1427_s17, %s1423_s16  ;;  %p47_p2 = scmp.eq.s32.totalorder %s1447_s22, 0 }
   0xe   : > { %s1834_s25 = smov (%p30_p0, %s29_s25), 0  ;;  %s1836_s26 = smov (!%p30_p0, %s32_s26), %s1443_s21 }
   0xf   : > { %1816 = sst [smem:[#allocation10_spill]] %s1834_s25  ;;  %p1537_p3 = por %p47_p2, %p46_p1 }
  0x10   : > { %p52_p4 = scmp.ne.s32.totalorder %s1423_s16, %s1419_s15  ;;  %p34_p5 = scmp.ge.s32.totalorder %s1836_s26, 2 }
  0x11   : > { %p53_p6 = scmp.eq.s32.totalorder %s987_s23, 0  ;;  %s112_s29 = ssub.s32 %s1439_s20, %s1834_s25 }
  0x12   : > { %s116_s30 = sadd.s32 1, %s1415_s14  ;;  %s1838_s26 = smov (%p34_p5, %s1836_s26), 0 }
  0x13   : > { %1818 = sst [smem:[#allocation11_spill]] %s1838_s26  ;;  %p1547_p7 = por %p53_p6, %p52_p4 }
  0x14   : > { %p126_p8 = scmp.ne.s32.totalorder %s1415_s14, %s1411_s13  ;;  %s36_s5 = ssub.s32 %s1443_s21, %s1838_s26 }
  0x15   : > { %p127_p9 = scmp.eq.s32.totalorder %s987_s23, 3  ;;  %p37_p10 = scmp.eq.s32.totalorder %s36_s5, 0 }
  0x16   : > { %s113_s6 = sor.u32 %s112_s29, %s36_s5  ;;  %p132_p13 = scmp.ne.s32.totalorder %s1411_s13, %s1407_s12 }
  0x17   : > { %p114_p11 = scmp.eq.s32.totalorder %s113_s6, 0  ;;  %p1555_p12 = por %p127_p9, %p126_p8 }
  0x18   : > { %s1560_s8 = scalar_select %p37_p10, %s1427_s17, %s39_s27  }
  0x19   : > { %s1563_s9 = scalar_select %p114_p11, %s1415_s14, %s116_s30  }
  0x1a   : > { %p133_p0 = scmp.eq.s32.totalorder %s988_s24, 3  ;;  %p1195_p1 = scmp.lt.s32.totalorder %s1447_s22, 4 }
  0x1b   : > { %s156_s11 = sand.u32 1, %s1427_s17   ;;  %s1181_s23 = smul.u32 1280, %s1443_s21 }
  0x1c   : > { %p1568_p2 = por %p133_p0, %p132_p13  ;;  %s1180_s15 = smul.u32 80, %s156_s11 }
  0x1d   : > { %p1576_p4 = pnand %p1195_p1, %p1537_p3  ;;  %s166_s30 = scalar_lea.hbm %s1806_s0, %s1181_s23 }
  0x1e   : > { %s160_s6 = scalar_lea.vmem [#allocation2], %s1180_s15  ;;  %p992_p5 = scmp.ge.s32.totalorder %s1447_s22, 1 }
  0x1f   : > { %s167_s24 = sshll.u32 %s160_s6, 4  ;;  %s157_s26 = scalar_lea.sflag [#allocation3], %s156_s11  ;;  %s168_s24 = int_to_ptr.vmem [resolvable:$true] %s167_s24 }
  0x20   : > { %p1301_p6 = pneg %p1576_p4  ;;  %s1312_s25 = scalar_lea.vmem %s168_s24, 1280 }
  0x21   : > { %p1313_p8 = scmp.ne.s32.totalorder %s168_s24, %s1312_s25  ;;  %s1449_s28 = smov [#allocation2]  }
  0x22   : > { %s1317_s21 = sshll.u32 %s1449_s28, 4  ;;  %s1318_s21 = int_to_ptr.vmem [resolvable:$false] %s1317_s21 }
  0x23   : > { %p1315_p9 = pnand %p1313_p8, %p1301_p6  ;;  %s1319_s20 = scalar_lea.vmem %s1318_s21, 2560 }
  0x24   : > { %p1320_p3 = scmp.lt.s32.totalorder %s168_s24, %s1318_s21  ;;  %p1321_p11 = scmp.lt.s32.totalorder %s1319_s20, %s1312_s25 }
  0x25   : > { %p1316_p10 = pneg %p1315_p9 }
  0x26   : > { %p1322_p13 = por %p1321_p11, %p1320_p3 }
  0x28   : > { %p1323_p0 = pnand %p1322_p13, %p1316_p10 }
  0x2a   : > { %1326 = shalt.err (!%p1323_p0)
}
  0x2b   : > { %s1450_s15 = smov 64   ;;  %s1451_s11 = smov 4  }
  0x2c   : > { %1190 = dma.hbm_to_vmem [thread:$0]  (!%p1576_p4), %s166_s30, 1280, %s168_s24, %s157_s26, %s1450_s15, %s1450_s15, %s1451_s11  }
  0x2d   : > { %p175_p1 = scmp.lt.s32.totalorder %s1447_s22, 5 }
  0x2f   : > { %p176_p6 = pnand %p992_p5, %p175_p1 }
  0x30   : > { %s181_s23 = sand.u32 (!%p176_p6), 1, %s1423_s16  }
  0x31   : > { %179 = sbr.rel (%p176_p6) target bundleno = 345 (0x159), region = 28  ;;  %s182_s21 = scalar_lea.sflag (!%p176_p6), [#allocation3], %s181_s23 }
  0x32   : > { %s1182_s5 = smul.u32 (!%p176_p6), 80, %s181_s23 }
  0x34   : > { %s185_s20 = scalar_lea.vmem (!%p176_p6), [#allocation2], %s1182_s5 }
  0x36   : > { %1398 = dma.done.wait (%p1547_p7), %s182_s21, 1280  }
  0x37   : > { %1400 = vsyncadd (%p1547_p7), %s182_s21, 4294966016  ;;  %s1065_s25 = sshll.u32 %s1431_s18, 5  ;;  %vm295_vm0 = vcmask 1043456   ;;  %v1287_v0 = vld [vmem:[%s1807_s1 + $0x14] ss:$0 sps:$4 sm:$0xff]   ;;  %v1288_v1 = vld [vmem:[%s1807_s1 + $0xc] sm:$0xff]  }
  0x38   : > { %s1597_s29 = scalar_lea.vmem %s185_s20, %s1065_s25 [#allocation2]  ;;  %vm282_vm1 = vcmask 195584   ;;  %1176 = vmatprep.subr.msk.bf16.mxu0 %vm295_vm0, %v1287_v0  ;;  %1177 = vmatprep.subr.msk.bf16.mxu1 %vm295_vm0, %v1287_v0  ;;  %v297_v2 = vsel %vm295_vm0, %v1287_v0, 0  ;;  %v1291_v5 = vld [vmem:[%s1807_s1 + $0x8] ss:$0 sps:$4 sm:$0xff]   ;;  %v1292_v6 = vld [vmem:[%s1807_s1 + $0x20] ss:$0 sps:$4 sm:$0xff]  }
  0x39   : > { %v1289_v3 = vld [vmem:[%s1597_s29 + $0x8] sm:$0xff]   ;;  %1113 = vmatpush3.bf16.msra.mxu0 %v297_v2  ;;  %1174 = vmatpush3.bf16.msra.mxu1 %v297_v2  ;;  %v1290_v4 = vld [vmem:[%s1597_s29 + $0x18] sm:$0xff]   ;;  %v1293_v7 = vld [vmem:[%s1597_s29 + $0x10] sm:$0xff]   ;;  %v414_v8 = vsel %vm295_vm0, %v1291_v5, 0  ;;  %v535_v10 = vsel %vm295_vm0, %v1292_v6, 0  ;;  %s994_s20 = sshll.u32 %s1431_s18, 3 }
  0x3a   : > { %1114 = vmatprep.subr.bf16.mxu0 %v1288_v1  ;;  %1173 = vmatprep.subr.bf16.mxu1 %v1288_v1  ;;  %v1294_v9 = vld [vmem:[%s1597_s29 + $0x20] sm:$0xff]   ;;  %v1296_v12 = vld [vmem:[%s1807_s1 + $0x18] sm:$0xff]   ;;  %v1298_v14 = vld [vmem:[%s1597_s29 + $0x28] sm:$0xff]   ;;  %p219_p7 = scmp.lt.s32.totalorder %s1435_s19, 1  ;;  %p221_p4 = scmp.lt.s32.totalorder %s994_s20, 15  ;;  %vm714_vm2 = vcmask 60416  }
  0x3b   : > { %1116 = vmatprep.mubr.msk.bf16.mxu0 %vm282_vm1, %v1289_v3  ;;  %1124 = vmatprep.mubr.msk.bf16.mxu1 %vm282_vm1, %v1290_v4  ;;  %v1295_v11 = vld [vmem:[%s1807_s1] sm:$0xff]   ;;  %vm731_vm3 = vcmask 64512   ;;  %s215_s28 = sand.u32 1, %s1411_s13   ;;  %s1060_s11 = sshll.u32 %s1435_s19, 1 }
  0x3c   : > { %v1297_v13 = vld [vmem:[%s1597_s29] sm:$0xff]   ;;  %s220_s25 = scalar_select %p219_p7, %s1435_s19, 1 }
  0x3d   : > { %1115 = vmatpush3.bf16.msra.mxu0 %v1288_v1  ;;  %1175 = vmatpush3.bf16.msra.mxu1 %v1288_v1  ;;  %s1840_s20 = smov (!%p221_p4, %s994_s20), 15  ;;  %s993_s15 = sshll.u32 %s215_s28, 3 }
  0x3e   : > { %1178 = vmatprep.subr.msk.bf16.mxu1 %vm295_vm0, %v1291_v5  ;;  %1179 = vmatprep.subr.msk.bf16.mxu0 %vm295_vm0, %v1292_v6  ;;  %s995_s29 = sshll.u32 %s1840_s20, 1  ;;  %s996_s26 = sshll.u32 %s220_s25, 5 }
  0x3f   : > { %s225_s27 = sadd.s32 %s996_s26, %s995_s29  ;;  %s856_s23 = sadd.s32 %s1431_s18, %s1060_s11 }
  0x40   : > { %1117 = vmatmul.mubr.msk.bf16.vlgmr.msra.gmra.mxu0 %vm282_vm1, %v1289_v3  ;;  %1125 = vmatmul.mubr.msk.bf16.vlgmr.msra.gmra.mxu1 %vm282_vm1, %v1290_v4  ;;  %s997_s30 = sshll.u32 %s225_s27, 2  ;;  %s1061_s5 = sshll.u32 %s856_s23, 7 }
  0x41   : > { %1133 = vmatpush3.bf16.msra.mxu1 %v414_v8  ;;  %1153 = vmatpush3.bf16.msra.mxu0 %v535_v10  ;;  %s1676_s24 = scalar_lea.vmem %s1808_s2, %s997_s30  ;;  %s217_s21 = scalar_lea.vmem [#allocation5], %s993_s15 }
  0x42   : > { %1120 = vmatprep.mubr.msk.bf16.mxu0 %vm282_vm1, %v1293_v7  ;;  %1128 = vmatprep.mubr.msk.bf16.mxu1 %vm282_vm1, %v1294_v9  ;;  %s860_s20 = sshll.u32 %s217_s21, 4  ;;  %s858_s19 = scalar_lea.hbm %s1809_s3, %s1061_s5  ;;  %s861_s20 = int_to_ptr.vmem [resolvable:$true] %s860_s20 }
  0x43   : > { %1134 = vmatprep.subr.bf16.mxu1 %v1295_v11  ;;  %1154 = vmatprep.subr.bf16.mxu0 %v1296_v12  ;;  %s841_s18 = scalar_lea.sflag [#allocation4], %s215_s28  ;;  %s1327_s26 = scalar_lea.vmem %s861_s20, 128 }
  0x44   : > { %p1328_p5 = scmp.ne.s32.totalorder %s861_s20, %s1327_s26  ;;  %s1452_s27 = smov [#allocation5]  }
  0x45   : > { %1135 = vmatpush3.bf16.msra.mxu1 %v1295_v11  ;;  %1155 = vmatpush3.bf16.msra.mxu0 %v1296_v12  ;;  %s1331_s30 = sshll.u32 %s1452_s27, 4  ;;  %s1332_s30 = int_to_ptr.vmem [resolvable:$false] %s1331_s30 }
  0x46   : > { %p1329_p8 = pnand %p1328_p5, %p1555_p12  ;;  %s1333_s6 = scalar_lea.vmem %s1332_s30, 256 }
  0x47   : > { %p1334_p10 = scmp.lt.s32.totalorder %s861_s20, %s1332_s30  ;;  %p1335_p3 = scmp.lt.s32.totalorder %s1333_s6, %s1327_s26 }
  0x48   : > { %1121 = vmatmul.mubr.msk.bf16.gmra.mxu0 %vm282_vm1, %v1293_v7  ;;  %1129 = vmatmul.mubr.msk.bf16.gmra.mxu1 %vm282_vm1, %v1294_v9  ;;  %p1330_p9 = pneg %p1329_p8 }
  0x49   : > { %1136 = vmatprep.mubr.msk.bf16.mxu1 %vm282_vm1, %v1297_v13  ;;  %1156 = vmatprep.mubr.msk.bf16.mxu0 %vm282_vm1, %v1289_v3  ;;  %p1336_p11 = por %p1335_p3, %p1334_p10 }
  0x4b   : > { %p1337_p13 = pnand %p1336_p11, %p1330_p9 }
  0x50   : > { %1137 = vmatmul.mubr.msk.bf16.vlgmr.msra.gmra.mxu1 %vm282_vm1, %v1289_v3  ;;  %1157 = vmatmul.mubr.msk.bf16.vlgmr.msra.gmra.mxu0 %vm282_vm1, %v1293_v7 }
  0x51   : > { %1140 = vmatprep.mubr.msk.bf16.mxu1 %vm282_vm1, %v1289_v3  ;;  %1160 = vmatprep.mubr.msk.bf16.mxu0 %vm282_vm1, %v1293_v7 }
  0x58   : > { %1141 = vmatmul.mubr.msk.bf16.gmra.mxu1 %vm282_vm1, %v1293_v7  ;;  %1161 = vmatmul.mubr.msk.bf16.gmra.mxu0 %vm282_vm1, %v1290_v4 }
  0x59   : > { %1144 = vmatprep.mubr.msk.bf16.mxu1 %vm282_vm1, %v1293_v7  ;;  %1164 = vmatprep.mubr.msk.bf16.mxu0 %vm282_vm1, %v1290_v4 }
  0x60   : > { %1145 = vmatmul.mubr.msk.bf16.gmra.mxu1 %vm282_vm1, %v1290_v4  ;;  %1165 = vmatmul.mubr.msk.bf16.gmra.mxu0 %vm282_vm1, %v1294_v9 }
  0x61   : > { %1148 = vmatprep.mubr.msk.bf16.mxu1 %vm282_vm1, %v1290_v4  ;;  %1168 = vmatprep.mubr.msk.bf16.mxu0 %vm282_vm1, %v1294_v9 }
  0x68   : > { %1149 = vmatmul.mubr.msk.bf16.gmra.mxu1 %vm282_vm1, %v1294_v9  ;;  %1169 = vmatmul.mubr.msk.bf16.gmra.mxu0 %vm282_vm1, %v1298_v14 }
 0x100   : > { %v1118_v15 = vpop.f32.mrf.mxu0  ;;  %v1654_v16 = vpop.f32.mrf.mxu1 }
 0x102   : > { %v333_v17 = vpop.f32.mrf.mxu0  ;;  %v1657_v18 = vpop.f32.mrf.mxu1 }
 0x104   : > { %v1119_v19 = vpop.f32.mrf.mxu0  ;;  %v1660_v20 = vpop.f32.mrf.mxu1 }
 0x106   : > { %v336_v21 = vpop.f32.mrf.mxu0  ;;  %v1662_v22 = vpop.f32.mrf.mxu1 }
 0x108   : > { %v1122_v23 = vpop.f32.mrf.mxu0  ;;  %v1665_v24 = vpop.f32.mrf.mxu1 }
 0x10a   : > { %v349_v25 = vpop.f32.mrf.mxu0  ;;  %v1667_v26 = vpop.f32.mrf.mxu1 }
 0x10c   : > { %v1123_v27 = vpop.f32.mrf.mxu0  ;;  %v1669_v28 = vpop.f32.mrf.mxu1 }
 0x10e   : > { %v352_v29 = vpop.f32.mrf.mxu0  ;;  %v1671_v30 = vpop.f32.mrf.mxu1 }
 0x110   : > { %v1138_v31 = vpop.f32.mrf.mxu1  ;;  %v1158_v32 = vpop.f32.mrf.mxu0 }
 0x111   : > { %v459_v33 = vadd.f32 %v1138_v31, %v1118_v15 }
 0x112   : > { %v450_v34 = vpop.f32.mrf.mxu1  ;;  %v571_v35 = vpop.f32.mrf.mxu0 }
 0x113   : > { %v636_v36 = vadd.f32 %v1158_v32, %v459_v33  ;;  %v451_v37 = vadd.f32 %v450_v34, %v333_v17 }
 0x114   : > { %v1139_v38 = vpop.f32.mrf.mxu1  ;;  %v1159_v39 = vpop.f32.mrf.mxu0 }
 0x115   : > { %v1068_v40 = vpack.c.bf16 %v636_v36, %v636_v36  ;;  %v634_v41 = vadd.f32 %v571_v35, %v451_v37  ;;  %v462_v42 = vadd.f32 %v1139_v38, %v1119_v19  ;;  %v771_v56 = vmul.f32 %v636_v36, %v636_v36 }
 0x116   : > { %v453_v43 = vpop.f32.mrf.mxu1  ;;  %v574_v44 = vpop.f32.mrf.mxu0  ;;  %v735_v1 = vsel %vm731_vm3, %v636_v36, 0.0 }
 0x117   : > { %717 = vst.msk [vmem:[%s1676_s24 + $0x8] sm:$0xf] %vm714_vm2, %v1068_v40  ;;  %v1066_v45 = vpack.c.bf16 %v634_v41, %v634_v41  ;;  %v637_v46 = vadd.f32 %v1159_v39, %v462_v42  ;;  %v454_v47 = vadd.f32 %v453_v43, %v336_v21  ;;  %v769_v50 = vmul.f32 %v634_v41, %v634_v41 }
 0x118   : > { %v1142_v48 = vpop.f32.mrf.mxu1  ;;  %v1162_v49 = vpop.f32.mrf.mxu0  ;;  %v732_v59 = vsel %vm731_vm3, %v634_v41, 0.0  ;;  %v788_v11 = vsel %vm731_vm3, %v771_v56, 0.0 }
 0x119   : > { %715 = vst.msk [vmem:[%s1676_s24] sm:$0xf] %vm714_vm2, %v1066_v45  ;;  %v475_v51 = vadd.f32 %v1142_v48, %v1122_v23  ;;  %v1069_v52 = vpack.c.bf16 %v637_v46, %v637_v46  ;;  %v635_v53 = vadd.f32 %v574_v44, %v454_v47  ;;  %v785_v2 = vsel %vm731_vm3, %v769_v50, 0.0 }
 0x11a   : > { %v466_v54 = vpop.f32.mrf.mxu1  ;;  %v587_v55 = vpop.f32.mrf.mxu0  ;;  %v772_v5 = vmul.f32 %v637_v46, %v637_v46  ;;  %v737_v15 = vsel %vm731_vm3, %v637_v46, 0.0 }
 0x11b   : > { %v640_v57 = vadd.f32 %v1162_v49, %v475_v51  ;;  %v467_v58 = vadd.f32 %v466_v54, %v349_v25  ;;  %718 = vst.msk [vmem:[%s1676_s24 + $0xc] sm:$0xf] %vm714_vm2, %v1069_v52  ;;  %v1067_v60 = vpack.c.bf16 %v635_v53, %v635_v53  ;;  %v733_v61 = vsel %vm731_vm3, %v635_v53, 0.0 }
 0x11c   : > { %v770_v62 = vmul.f32 %v635_v53, %v635_v53  ;;  %v1143_v63 = vpop.f32.mrf.mxu1  ;;  %v1163_v0 = vpop.f32.mrf.mxu0  ;;  %v734_v3 = vadd.f32 %v733_v61, %v732_v59  ;;  %v790_v34 = vsel %vm731_vm3, %v772_v5, 0.0 }
 0x11d   : > { %v1072_v4 = vpack.c.bf16 %v640_v57, %v640_v57  ;;  %716 = vst.msk [vmem:[%s1676_s24 + $0x4] sm:$0xf] %vm714_vm2, %v1067_v60  ;;  %v638_v7 = vadd.f32 %v587_v55, %v467_v58  ;;  %v478_v8 = vadd.f32 %v1143_v63, %v1123_v27  ;;  %v775_v35 = vmul.f32 %v640_v57, %v640_v57 }
 0x11e   : > { %v786_v6 = vsel %vm731_vm3, %v770_v62, 0.0  ;;  %v469_v9 = vpop.f32.mrf.mxu1  ;;  %v590_v10 = vpop.f32.mrf.mxu0  ;;  %v736_v12 = vadd.f32 %v735_v1, %v734_v3  ;;  %v743_v51 = vsel %vm731_vm3, %v640_v57, 0.0 }
 0x11f   : > { %v787_v13 = vadd.f32 %v786_v6, %v785_v2  ;;  %721 = vst.msk [vmem:[%s1676_s24 + $0x18] sm:$0xf] %vm714_vm2, %v1072_v4  ;;  %v470_v14 = vadd.f32 %v469_v9, %v352_v29  ;;  %v1070_v17 = vpack.c.bf16 %v638_v7, %v638_v7  ;;  %v773_v19 = vmul.f32 %v638_v7, %v638_v7 }
 0x120   : > { %v641_v21 = vadd.f32 %v1163_v0, %v478_v8  ;;  %v1146_v23 = vpop.f32.mrf.mxu1  ;;  %v1166_v25 = vpop.f32.mrf.mxu0  ;;  %v738_v27 = vadd.f32 %v737_v15, %v736_v12  ;;  %v739_v29 = vsel %vm731_vm3, %v638_v7, 0.0  ;;  %v796_v61 = vsel %vm731_vm3, %v775_v35, 0.0 }
 0x121   : > { %v789_v31 = vadd.f32 %v788_v11, %v787_v13  ;;  %v639_v32 = vadd.f32 %v590_v10, %v470_v14  ;;  %v491_v33 = vadd.f32 %v1146_v23, %v1654_v16  ;;  %719 = vst.msk [vmem:[%s1676_s24 + $0x10] sm:$0xf] %vm714_vm2, %v1070_v17  ;;  %v792_v43 = vsel %vm731_vm3, %v773_v19, 0.0 }
 0x122   : > { %v1073_v36 = vpack.c.bf16 %v641_v21, %v641_v21  ;;  %v482_v37 = vpop.f32.mrf.mxu1  ;;  %v603_v38 = vpop.f32.mrf.mxu0  ;;  %v740_v39 = vadd.f32 %v739_v29, %v738_v27  ;;  %v776_v52 = vmul.f32 %v641_v21, %v641_v21  ;;  %v745_v62 = vsel %vm731_vm3, %v641_v21, 0.0 }
 0x123   : > { %v791_v40 = vadd.f32 %v790_v34, %v789_v31  ;;  %v1071_v41 = vpack.c.bf16 %v639_v32, %v639_v32  ;;  %v741_v42 = vsel %vm731_vm3, %v639_v32, 0.0  ;;  %v774_v16 = vmul.f32 %v639_v32, %v639_v32 }
 0x124   : > { %722 = vst.msk [vmem:[%s1676_s24 + $0x1c] sm:$0xf] %vm714_vm2, %v1073_v36  ;;  %v644_v44 = vadd.f32 %v1166_v25, %v491_v33  ;;  %v483_v45 = vadd.f32 %v482_v37, %v1657_v18  ;;  %v1147_v46 = vpop.f32.mrf.mxu1  ;;  %v1167_v47 = vpop.f32.mrf.mxu0  ;;  %v742_v49 = vadd.f32 %v741_v42, %v740_v39  ;;  %v798_v3 = vsel %vm731_vm3, %v776_v52, 0.0 }
 0x125   : > { %v793_v48 = vadd.f32 %v792_v43, %v791_v40  ;;  %720 = vst.msk [vmem:[%s1676_s24 + $0x14] sm:$0xf] %vm714_vm2, %v1071_v41  ;;  %v494_v50 = vadd.f32 %v1147_v46, %v1660_v20  ;;  %v794_v53 = vsel %vm731_vm3, %v774_v16, 0.0 }
 0x126   : > { %v1076_v54 = vpack.c.bf16 %v644_v44, %v644_v44  ;;  %v485_v55 = vpop.f32.mrf.mxu1  ;;  %v606_v56 = vpop.f32.mrf.mxu0  ;;  %v744_v58 = vadd.f32 %v743_v51, %v742_v49  ;;  %v642_v18 = vadd.f32 %v603_v38, %v483_v45  ;;  %v779_v12 = vmul.f32 %v644_v44, %v644_v44 }
 0x127   : > { %v795_v59 = vadd.f32 %v794_v53, %v793_v48  ;;  %v645_v60 = vadd.f32 %v1167_v47, %v494_v50  ;;  %v486_v20 = vadd.f32 %v485_v55, %v1662_v22  ;;  %v751_v34 = vsel %vm731_vm3, %v644_v44, 0.0 }
 0x128   : > { %725 = vst.msk [vmem:[%s1676_s24 + $0x28] sm:$0xf] %vm714_vm2, %v1076_v54  ;;  %v1150_v57 = vpop.f32.mrf.mxu1  ;;  %v1170_v63 = vpop.f32.mrf.mxu0  ;;  %v1074_v1 = vpack.c.bf16 %v642_v18, %v642_v18  ;;  %v746_v2 = vadd.f32 %v745_v62, %v744_v58  ;;  %v747_v4 = vsel %vm731_vm3, %v642_v18, 0.0  ;;  %v777_v5 = vmul.f32 %v642_v18, %v642_v18 }
 0x129   : > { %v797_v0 = vadd.f32 %v796_v61, %v795_v59  ;;  %v1077_v6 = vpack.c.bf16 %v645_v60, %v645_v60  ;;  %v643_v11 = vadd.f32 %v606_v56, %v486_v20  ;;  %v507_v22 = vadd.f32 %v1150_v57, %v1665_v24 }
 0x12a   : > { %v498_v7 = vpop.f32.mrf.mxu1  ;;  %v619_v8 = vpop.f32.mrf.mxu0  ;;  %723 = vst.msk [vmem:[%s1676_s24 + $0x20] sm:$0xf] %vm714_vm2, %v1074_v1  ;;  %v748_v9 = vadd.f32 %v747_v4, %v746_v2  ;;  %v800_v13 = vsel %vm731_vm3, %v777_v5, 0.0  ;;  %v780_v35 = vmul.f32 %v645_v60, %v645_v60  ;;  %v804_v39 = vsel %vm731_vm3, %v779_v12, 0.0 }
 0x12b   : > { %v799_v10 = vadd.f32 %v798_v3, %v797_v0  ;;  %726 = vst.msk [vmem:[%s1676_s24 + $0x2c] sm:$0xf] %vm714_vm2, %v1077_v6  ;;  %v499_v14 = vadd.f32 %v498_v7, %v1667_v26  ;;  %v1075_v19 = vpack.c.bf16 %v643_v11, %v643_v11  ;;  %v749_v21 = vsel %vm731_vm3, %v643_v11, 0.0 }
 0x12c   : > { %v1151_v15 = vpop.f32.mrf.mxu1  ;;  %v778_v23 = vmul.f32 %v643_v11, %v643_v11  ;;  %v1171_v25 = vpop.f32.mrf.mxu0  ;;  %v750_v31 = vadd.f32 %v749_v21, %v748_v9  ;;  %v648_v27 = vadd.f32 %v1170_v63, %v507_v22  ;;  %v753_v40 = vsel %vm731_vm3, %v645_v60, 0.0 }
 0x12d   : > { %v801_v17 = vadd.f32 %v800_v13, %v799_v10  ;;  %v646_v32 = vadd.f32 %v619_v8, %v499_v14  ;;  %v510_v24 = vadd.f32 %v1151_v15, %v1669_v28  ;;  %724 = vst.msk [vmem:[%s1676_s24 + $0x24] sm:$0xf] %vm714_vm2, %v1075_v19  ;;  %v806_v46 = vsel %vm731_vm3, %v780_v35, 0.0 }
 0x12e   : > { %v501_v33 = vpop.f32.mrf.mxu1  ;;  %v802_v26 = vsel %vm731_vm3, %v778_v23, 0.0  ;;  %v752_v36 = vadd.f32 %v751_v34, %v750_v31  ;;  %v1080_v38 = vpack.c.bf16 %v648_v27, %v648_v27  ;;  %v622_v42 = vpop.f32.mrf.mxu0  ;;  %v783_v47 = vmul.f32 %v648_v27, %v648_v27 }
 0x12f   : > { %v502_v29 = vadd.f32 %v501_v33, %v1671_v30  ;;  %v803_v37 = vadd.f32 %v802_v26, %v801_v17  ;;  %v1078_v28 = vpack.c.bf16 %v646_v32, %v646_v32  ;;  %v781_v41 = vmul.f32 %v646_v32, %v646_v32 }
 0x130   : > { %729 = vst.msk [vmem:[%s1676_s24 + $0x38] sm:$0xf] %vm714_vm2, %v1080_v38  ;;  %v754_v16 = vadd.f32 %v753_v40, %v752_v36  ;;  %v649_v44 = vadd.f32 %v1171_v25, %v510_v24  ;;  %v755_v30 = vsel %vm731_vm3, %v646_v32, 0.0  ;;  %v759_v58 = vsel %vm731_vm3, %v648_v27, 0.0 }
 0x131   : > { %v805_v43 = vadd.f32 %v804_v39, %v803_v37  ;;  %v647_v45 = vadd.f32 %v622_v42, %v502_v29  ;;  %727 = vst.msk [vmem:[%s1676_s24 + $0x30] sm:$0xf] %vm714_vm2, %v1078_v28  ;;  %v808_v51 = vsel %vm731_vm3, %v781_v41, 0.0  ;;  %v812_v62 = vsel %vm731_vm3, %v783_v47, 0.0 }
 0x132   : > { %v756_v48 = vadd.f32 %v755_v30, %v754_v16  ;;  %v1081_v50 = vpack.c.bf16 %v649_v44, %v649_v44  ;;  %v784_v59 = vmul.f32 %v649_v44, %v649_v44  ;;  %v761_v20 = vsel %vm731_vm3, %v649_v44, 0.0 }
 0x133   : > { %v807_v49 = vadd.f32 %v806_v46, %v805_v43  ;;  %v1079_v52 = vpack.c.bf16 %v647_v45, %v647_v45  ;;  %v757_v53 = vsel %vm731_vm3, %v647_v45, 0.0  ;;  %v782_v54 = vmul.f32 %v647_v45, %v647_v45 }
 0x134   : > { %730 = vst.msk [vmem:[%s1676_s24 + $0x3c] sm:$0xf] %vm714_vm2, %v1081_v50  ;;  %v758_v56 = vadd.f32 %v757_v53, %v756_v48  ;;  %v814_v0 = vsel %vm731_vm3, %v784_v59, 0.0  ;;  %v822_v5 = vlaneseq }
 0x135   : > { %v809_v55 = vadd.f32 %v808_v51, %v807_v49  ;;  %728 = vst.msk [vmem:[%s1676_s24 + $0x34] sm:$0xf] %vm714_vm2, %v1079_v52  ;;  %v810_v18 = vsel %vm731_vm3, %v782_v54, 0.0 }
 0x136   : > { %v760_v60 = vadd.f32 %v759_v58, %v758_v56  ;;  %v823_v10 = vshrl.u32 %v822_v5, 7 }
 0x137   : > { %v811_v61 = vadd.f32 %v810_v18, %v809_v55 }
 0x138   : > { %v762_v57 = vadd.f32 %v761_v20, %v760_v60  ;;  %vm824_vm4 = vcmp.eq.s32.totalorder %v823_v10, 0  ;;  %vm826_vm5 = vcmp.eq.s32.totalorder %v823_v10, 1 }
 0x139   : > { %v813_v63 = vadd.f32 %v812_v62, %v811_v61 }
 0x13a   : > { %v763_v1 = vrot.slane %v762_v57, 4 }
 0x13b   : > { %v815_v2 = vadd.f32 %v814_v0, %v813_v63 }
 0x13c   : > { %v764_v3 = vadd.f32 %v763_v1, %v762_v57 }
 0x13d   : > { %v816_v4 = vrot.slane %v815_v2, 4 }
 0x13e   : > { %v765_v6 = vrot.slane %v764_v3, 2 }
 0x13f   : > { %v817_v7 = vadd.f32 %v816_v4, %v815_v2 }
 0x140   : > { %v766_v8 = vadd.f32 %v765_v6, %v764_v3 }
 0x141   : > { %v818_v9 = vrot.slane %v817_v7, 2 }
 0x142   : > { %v767_v11 = vrot.slane %v766_v8, 1 }
 0x143   : > { %v819_v22 = vadd.f32 %v818_v9, %v817_v7 }
 0x144   : > { %v768_v12 = vadd.f32 %v767_v11, %v766_v8 }
 0x145   : > { %v820_v13 = vrot.slane %v819_v22, 1 }
 0x146   : > { %v825_v15 = vsel %vm824_vm4, %v768_v12, 0.0 }
 0x147   : > { %v821_v14 = vadd.f32 %v820_v13, %v819_v22 }
 0x149   : > { %v827_v17 = vsel %vm826_vm5, %v821_v14, 0.0 }
 0x14a   : > { %v828_v19 = vadd.f32 %v827_v17, %v825_v15 }
 0x14c   : > { %829 = vst.msk [vmem:[%s217_s21] sm:$0xff] %vm731_vm3, %v828_v19 }
 0x14d   : > { %1340 = shalt.err (!%p1337_p13)
}
 0x14e   : > { %s1341_s4 = scalar_lea.hbm %s858_s19, 128  ;;  %s1345_s15 = scalar_lea.hbm %s1809_s3, 512 }
 0x14f   : > { %p1342_p0 = scmp.ne.s32.totalorder %s858_s19, %s1341_s4  ;;  %p1346_p7 = scmp.lt.s32.totalorder %s858_s19, %s1809_s3 }
 0x150   : > { %p1347_p4 = scmp.lt.s32.totalorder %s1345_s15, %s1341_s4 }
 0x151   : > { %p1343_p1 = pnand %p1342_p0, %p1555_p12 }
 0x152   : > { %p1348_p5 = por %p1347_p4, %p1346_p7 }
 0x153   : > { %p1344_p6 = pneg %p1343_p1 }
 0x155   : > { %p1349_p8 = pnand %p1348_p5, %p1344_p6 }
 0x157   : > { %1352 = shalt.err (!%p1349_p8)
}
 0x158   : > { %1185 = dma.vmem_to_hbm [thread:$0]  (%p1555_p12), %s861_s20, 128, %s858_s19, %s841_s18  }
 0x159 PF: > { %p1196_p9 = scmp.ge.s32.totalorder %s1447_s22, 2  ;;  %s885_s5 = sand.u32 1, %s1407_s12  }
 0x15a   : > { %s886_s21 = scalar_lea.sflag [#allocation4], %s885_s5 }
 0x15b   : > { %p1192_p10 = pnand %p1196_p9, %p1568_p2 }
 0x15d   : > { %p1193_p3 = pneg %p1192_p10 }
 0x15f   : > { %1402 = dma.done.wait (%p1193_p3), %s886_s21, 128  }
 0x160   : > { %1404 = vsyncadd (%p1193_p3), %s886_s21, 4294967168  ;;  %s20_s22 = sadd.s32 1, %s1447_s22   ;;  %s1823_s18 = sld [smem:[#allocation8_spill]] }
 0x161   : > { %p17_p11 = scmp.ge.s32.totalorder %s20_s22, 6   ;;  %s1824_s19 = sld [smem:[#allocation9_spill]] }
 0x162   : > { %s1825_s20 = sld [smem:[#allocation10_spill]]  ;;  %s1827_s12 = smov %s1411_s13 }
 0x163   : > { %s1826_s21 = sld [smem:[#allocation11_spill]]  ;;  %s1828_s13 = smov %s1415_s14 }
 0x164   : > { %s1829_s14 = smov %s1563_s9  ;;  %s1830_s15 = smov %s1423_s16 }
 0x165   : > { %s1831_s16 = smov %s1427_s17  ;;  %s1832_s17 = smov %s1560_s8 }
 0x166   :  { %19 = sbr.rel (!%p17_p11) target bundleno = 9 (0x9), region = 88 }
 0x16b   :  { %891 = vsyncpa [#allocation3], 1 }
 0x16c   :  { %893 = vsyncpa [#allocation3 + $0x1], 1 }
 0x16d   :  { %894 = vsyncpa [#allocation4], 1 }
 0x16e   :  { %896 = vsyncpa [#allocation4 + $0x1], 1 }

</bundles_post_ra>
